<compile_context>
chip_gen: v7x
topology: tpu7x:2x2x1
jax: 0.10.0
libtpu: 0.0.40
codegen_flags: <defaults>
</compile_context>

<pallas_src>
import math

import jax
import jax.numpy as jnp
from jax.experimental import pallas as pl
from jax.experimental.pallas import tpu as pltpu


# ----------------------------------------------------------------------------
# Parameter construction (deterministic, mimics SubModule.weight_init scheme)
# ----------------------------------------------------------------------------
def init_mlp_params(key, filter_channels, no_residual=False):
    """Returns list of (W, b) with W: (C_in, C_out) matmul layout, b: (1, C_out)."""
    params = []
    c0 = filter_channels[0]
    for l in range(len(filter_channels) - 1):
        if no_residual or l == 0:
            cin = filter_channels[l]
        else:
            cin = filter_channels[l] + c0
        cout = filter_channels[l + 1]
        key, kw, kb = jax.random.split(key, 3)
        # Conv2d 1x1 weight ~ N(0, sqrt(2 / (k*k*out_channels)))  (weight_init)
        std = math.sqrt(2.0 / (1 * 1 * cout))
        w = jax.random.normal(kw, (cin, cout), jnp.float32) * std
        # bias: PyTorch default U(-1/sqrt(fan_in), 1/sqrt(fan_in))
        bound = 1.0 / math.sqrt(cin)
        b = jax.random.uniform(kb, (1, cout), jnp.float32, minval=-bound, maxval=bound)
        params.append((w, b))
    return params


# ----------------------------------------------------------------------------
# Pallas kernel (channels-major: activation tiles are (C, tm), rows on lanes)
# ----------------------------------------------------------------------------
def _make_mlp_kernel(num_layers, no_residual, compute_dtype):
    cdtype = jnp.dtype(compute_dtype)

    def kernel(x_ref, *refs):
        out_ref = refs[-1]
        prefs = refs[:-1]
        # In-kernel f32 -> compute-dtype cast (input DMA stays f32; the cast is
        # cheap VPU work hidden under the DMA).
        y = x_ref[...].astype(cdtype)          # (C0, tm)
        tmpy = y                               # original feature tile (residual)
        idx = 0
        for i in range(num_layers):
            if no_residual or i == 0:
                wt = prefs[idx][...]           # (C_out, C_in)
                b = prefs[idx + 1][...]        # (C_out, 1) f32
                idx += 2
                z = jnp.dot(wt, y, preferred_element_type=jnp.float32)
            else:
                # concat([y, tmpy], channel): W @ concat == Wa @ y + Wb @ tmpy
                wa = prefs[idx][...]           # (C_out, C_prev)
                wb = prefs[idx + 1][...]       # (C_out, C0)
                b = prefs[idx + 2][...]        # (C_out, 1) f32
                idx += 3
                # TODO(synk): on v7x, fuse the two dots into one MRB accumulator
                # (matmul_push_rhs/matmul_acc_lhs) if the VPU add ever shows up
                # on the critical path.
                z = (jnp.dot(wa, y, preferred_element_type=jnp.float32)
                     + jnp.dot(wb, tmpy, preferred_element_type=jnp.float32))
            z = z + b                          # bias add in f32
            if i != num_layers - 1:
                # nn.LeakyReLU() default slope 0.01; mul+max (not cmp+select).
                # Kept in f32 so the same code is correct/fast on v5e too.
                z = jnp.maximum(z, z * jnp.float32(0.01))
                y = z.astype(cdtype)           # back to matmul dtype
            else:
                y = z
        out_ref[...] = y.astype(out_ref.dtype)

    return kernel


def mlp_pallas(feature, params, no_residual=False, compute_dtype=jnp.bfloat16):
    """feature: (B, C0, H, W) float32 (NCHW, like the PyTorch module)."""
    B, C0, H, W = feature.shape
    num_layers = len(params)
    c_last = params[-1][0].shape[1]
    rows = H * W

    # --- Flatten params: W^T in (C_out, C_in) layout, residual layers split
    # --- into the [prev | tmpy] halves; biases (C_out, 1) in f32.
    flat_args = []
    c_prev = C0
    widths = [C0, c_last]
    for i, (w, b) in enumerate(params):
        cout = w.shape[1]
        b_t = b.reshape(cout, 1).astype(jnp.float32)
        if no_residual or i == 0:
            flat_args += [jnp.transpose(w).astype(compute_dtype), b_t]
        else:
            flat_args += [jnp.transpose(w[:c_prev]).astype(compute_dtype),
                          jnp.transpose(w[c_prev:]).astype(compute_dtype),
                          b_t]
        widths += [w.shape[0], cout]
        c_prev = cout
    param_bytes = sum(int(a.size) * a.dtype.itemsize for a in flat_args)
    c_max = max(widths)
    itemsize = jnp.dtype(compute_dtype).itemsize

    # --- VMEM budget: generation-aware capacity with ~15% headroom ----------
    try:
        vmem_cap = int(pltpu.get_tpu_info().vmem_capacity_bytes)
    except Exception:
        vmem_cap = 64 * 1024 * 1024            # conservative (v7x) fallback
    budget = max(16 * 1024 * 1024, int(vmem_cap * 0.85))

    def est_vmem(tm):
        return (2 * C0 * tm * 4                # double-buffered f32 input tiles
                + 2 * c_last * tm * 4          # double-buffered f32 output tiles
                + 2 * param_bytes              # params (worst case: 2x resident)
                + 4 * c_max * tm * 4           # live f32 activation tiles
                + 2 * c_max * tm * itemsize)   # compute-dtype copies

    # --- Row-tile selection: large lane tiles for small-channel nets --------
    if c_max <= 64:
        tm_cap = 8192
    elif c_max <= 256:
        tm_cap = 2048
    else:
        tm_cap = 1024
    if rows % 128 == 0:
        tm_eff = min(tm_cap, rows)             # multiple of 128
    elif rows <= tm_cap:
        tm_eff = rows                          # full-row block (always legal)
    else:
        tm_eff = tm_cap
    # Shrink tm to fit the VMEM budget (stay a multiple of 128).
    while tm_eff >= 256 and tm_eff % 256 == 0 and est_vmem(tm_eff) > budget:
        tm_eff //= 2
    # Megacore: prefer an even number (>=4) of parallel grid steps.
    def total_steps(tm):
        return B * pl.cdiv(rows, tm)
    while (tm_eff > 256 and tm_eff % 256 == 0
           and (total_steps(tm_eff) < 4 or total_steps(tm_eff) % 2 != 0)):
        tm_eff //= 2

    grid = (B, pl.cdiv(rows, tm_eff))
    x3 = feature.reshape(B, C0, rows)          # free reshape for NCHW input

    kernel = _make_mlp_kernel(num_layers, no_residual, compute_dtype)

    def run(single_buffer_params):
        if single_buffer_params:
            # Grid-invariant weights/biases: whole array resident in VMEM once.
            def pspec(a):
                return pl.BlockSpec(memory_space=pltpu.MemorySpace.VMEM)
        else:
            # Fallback: blocked spec with a constant index map.
            def pspec(a):
                return pl.BlockSpec(a.shape, lambda b, i: (0,) * a.ndim)
        in_specs = ([pl.BlockSpec((None, C0, tm_eff), lambda b, i: (b, 0, i))]
                    + [pspec(a) for a in flat_args])
        out_specs = pl.BlockSpec((None, c_last, tm_eff), lambda b, i: (b, 0, i))
        return pl.pallas_call(
            kernel,
            out_shape=jax.ShapeDtypeStruct((B, c_last, rows), jnp.float32),
            grid=grid,
            in_specs=in_specs,
            out_specs=out_specs,
            compiler_params=pltpu.CompilerParams(
                dimension_semantics=("parallel", "parallel"),
                vmem_limit_bytes=int(budget)),
        )(x3, *flat_args)

    try:
        out = run(True)
    except Exception:
        out = run(False)

    return out.reshape(B, c_last, H, W)        # free reshape (channels-major kept)


# ----------------------------------------------------------------------------
# Pure-JAX reference (mirrors the PyTorch forward exactly, f32 throughout)
# ----------------------------------------------------------------------------
def mlp_reference(feature, params, no_residual=False):
    y = feature
    tmpy = feature
    n = len(params)
    for i, (w, b) in enumerate(params):
        inp = y if (no_residual or i == 0) else jnp.concatenate([y, tmpy], axis=1)
        z = jnp.einsum("bchw,cd->bdhw", inp, w) + b.reshape(1, -1, 1, 1)
        if i != n - 1:
            z = jnp.where(z > 0, z, 0.01 * z)
        y = z
    return y


if __name__ == "__main__":
    key = jax.random.PRNGKey(0)
    k_feat, k_params = jax.random.split(key)

    # Small shapes consistent with the module: NCHW feature, MLP over channels.
    filter_channels = [4, 32, 32, 1]
    B, C0, H, W = 2, filter_channels[0], 16, 16

    feature = jax.random.normal(k_feat, (B, C0, H, W), jnp.float32)
    params = init_mlp_params(k_params, filter_channels, no_residual=False)

    ref = mlp_reference(feature, params, no_residual=False)

    # f32 compute path: tight semantics check against the pure-JAX reference.
    out_f32 = jax.block_until_ready(
        mlp_pallas(feature, params, no_residual=False, compute_dtype=jnp.float32))
    assert out_f32.shape == (B, filter_channels[-1], H, W), out_f32.shape
    assert jnp.allclose(out_f32, ref, atol=1e-3, rtol=1e-3), (
        float(jnp.max(jnp.abs(out_f32 - ref)))
    )

    # bf16 matmul operands (f32 accumulate / pointwise): the performance config.
    out_bf16 = jax.block_until_ready(
        mlp_pallas(feature, params, no_residual=False, compute_dtype=jnp.bfloat16))
    assert out_bf16.shape == (B, filter_channels[-1], H, W), out_bf16.shape
    assert jnp.allclose(out_bf16, ref, atol=1e-1, rtol=5e-2), (
        float(jnp.max(jnp.abs(out_bf16 - ref)))
    )

    print("KERNEL_OK")
</pallas_src>

<mosaic_0001>
module attributes {stable_mosaic.version = 11 : i64} {
  func.func @kernel(%arg0: i32, %arg1: i32, %arg2: memref<1x4x256xf32, #tpu.memory_space<vmem>>, %arg3: memref<32x4xf32, #tpu.memory_space<vmem>>, %arg4: memref<32x1xf32, #tpu.memory_space<vmem>>, %arg5: memref<32x32xf32, #tpu.memory_space<vmem>>, %arg6: memref<32x4xf32, #tpu.memory_space<vmem>>, %arg7: memref<32x1xf32, #tpu.memory_space<vmem>>, %arg8: memref<1x32xf32, #tpu.memory_space<vmem>>, %arg9: memref<1x4xf32, #tpu.memory_space<vmem>>, %arg10: memref<1x1xf32, #tpu.memory_space<vmem>>, %arg11: memref<1x1x256xf32, #tpu.memory_space<vmem>>) attributes {dimension_semantics = [#tpu.dimension_semantics<parallel>, #tpu.dimension_semantics<parallel>], iteration_bounds = array<i64: 2, 1>, scalar_prefetch = 0 : i64, scratch_operands = 0 : i64, tpu.core_type = #tpu.core_type<tc>, window_params = [{transform_indices = @transform_0, window_bounds = array<i64: 1, 4, 256>}, {pipeline_mode = #tpu.pipeline_mode<synchronous>, transform_indices = @transform_1, window_bounds = array<i64: 32, 4>}, {pipeline_mode = #tpu.pipeline_mode<synchronous>, transform_indices = @transform_2, window_bounds = array<i64: 32, 1>}, {pipeline_mode = #tpu.pipeline_mode<synchronous>, transform_indices = @transform_3, window_bounds = array<i64: 32, 32>}, {pipeline_mode = #tpu.pipeline_mode<synchronous>, transform_indices = @transform_4, window_bounds = array<i64: 32, 4>}, {pipeline_mode = #tpu.pipeline_mode<synchronous>, transform_indices = @transform_5, window_bounds = array<i64: 32, 1>}, {pipeline_mode = #tpu.pipeline_mode<synchronous>, transform_indices = @transform_6, window_bounds = array<i64: 1, 32>}, {pipeline_mode = #tpu.pipeline_mode<synchronous>, transform_indices = @transform_7, window_bounds = array<i64: 1, 4>}, {pipeline_mode = #tpu.pipeline_mode<synchronous>, transform_indices = @transform_8, window_bounds = array<i64: 1, 1>}, {transform_indices = @transform_9, window_bounds = array<i64: 1, 1, 256>}]} {
    %c0 = arith.constant 0 : index
    %c0_0 = arith.constant 0 : index
    %c0_1 = arith.constant 0 : index
    %0 = vector.load %arg2[%c0, %c0_0, %c0_1] : memref<1x4x256xf32, #tpu.memory_space<vmem>>, vector<1x4x256xf32>
    %1 = vector.shape_cast %0 : vector<1x4x256xf32> to vector<4x256xf32>
    %c0_2 = arith.constant 0 : index
    %c0_3 = arith.constant 0 : index
    %2 = vector.load %arg3[%c0_2, %c0_3] : memref<32x4xf32, #tpu.memory_space<vmem>>, vector<32x4xf32>
    %c0_4 = arith.constant 0 : index
    %c0_5 = arith.constant 0 : index
    %3 = vector.load %arg4[%c0_4, %c0_5] : memref<32x1xf32, #tpu.memory_space<vmem>>, vector<32x1xf32>
    %cst = arith.constant dense<0.000000e+00> : vector<32x256xf32>
    %4 = tpu.matmul %2, %1, %cst {dimension_numbers = #tpu.dot_dimension_numbers<[1], [0], [0], [1], [0, 0, 1, 1], [], []>} : vector<32x4xf32>, vector<4x256xf32>, vector<32x256xf32> -> vector<32x256xf32>
    %5 = vector.broadcast %3 : vector<32x1xf32> to vector<32x256xf32>
    %6 = arith.addf %4, %5 : vector<32x256xf32>
    %cst_6 = arith.constant 0.00999999977 : f32
    %7 = vector.broadcast %cst_6 : f32 to vector<32x256xf32>
    %8 = arith.mulf %6, %7 : vector<32x256xf32>
    %9 = arith.maximumf %6, %8 : vector<32x256xf32>
    %c0_7 = arith.constant 0 : index
    %c0_8 = arith.constant 0 : index
    %10 = vector.load %arg5[%c0_7, %c0_8] : memref<32x32xf32, #tpu.memory_space<vmem>>, vector<32x32xf32>
    %c0_9 = arith.constant 0 : index
    %c0_10 = arith.constant 0 : index
    %11 = vector.load %arg6[%c0_9, %c0_10] : memref<32x4xf32, #tpu.memory_space<vmem>>, vector<32x4xf32>
    %c0_11 = arith.constant 0 : index
    %c0_12 = arith.constant 0 : index
    %12 = vector.load %arg7[%c0_11, %c0_12] : memref<32x1xf32, #tpu.memory_space<vmem>>, vector<32x1xf32>
    %cst_13 = arith.constant dense<0.000000e+00> : vector<32x256xf32>
    %13 = tpu.matmul %10, %9, %cst_13 {dimension_numbers = #tpu.dot_dimension_numbers<[1], [0], [0], [1], [0, 0, 1, 1], [], []>} : vector<32x32xf32>, vector<32x256xf32>, vector<32x256xf32> -> vector<32x256xf32>
    %cst_14 = arith.constant dense<0.000000e+00> : vector<32x256xf32>
    %14 = tpu.matmul %11, %1, %cst_14 {dimension_numbers = #tpu.dot_dimension_numbers<[1], [0], [0], [1], [0, 0, 1, 1], [], []>} : vector<32x4xf32>, vector<4x256xf32>, vector<32x256xf32> -> vector<32x256xf32>
    %15 = arith.addf %13, %14 : vector<32x256xf32>
    %16 = vector.broadcast %12 : vector<32x1xf32> to vector<32x256xf32>
    %17 = arith.addf %15, %16 : vector<32x256xf32>
    %cst_15 = arith.constant 0.00999999977 : f32
    %18 = vector.broadcast %cst_15 : f32 to vector<32x256xf32>
    %19 = arith.mulf %17, %18 : vector<32x256xf32>
    %20 = arith.maximumf %17, %19 : vector<32x256xf32>
    %c0_16 = arith.constant 0 : index
    %c0_17 = arith.constant 0 : index
    %21 = vector.load %arg8[%c0_16, %c0_17] : memref<1x32xf32, #tpu.memory_space<vmem>>, vector<1x32xf32>
    %c0_18 = arith.constant 0 : index
    %c0_19 = arith.constant 0 : index
    %22 = vector.load %arg9[%c0_18, %c0_19] : memref<1x4xf32, #tpu.memory_space<vmem>>, vector<1x4xf32>
    %c0_20 = arith.constant 0 : index
    %c0_21 = arith.constant 0 : index
    %23 = vector.load %arg10[%c0_20, %c0_21] : memref<1x1xf32, #tpu.memory_space<vmem>>, vector<1x1xf32>
    %cst_22 = arith.constant dense<0.000000e+00> : vector<1x256xf32>
    %24 = tpu.matmul %21, %20, %cst_22 {dimension_numbers = #tpu.dot_dimension_numbers<[1], [0], [0], [1], [0, 0, 1, 1], [], []>} : vector<1x32xf32>, vector<32x256xf32>, vector<1x256xf32> -> vector<1x256xf32>
    %cst_23 = arith.constant dense<0.000000e+00> : vector<1x256xf32>
    %25 = tpu.matmul %22, %1, %cst_23 {dimension_numbers = #tpu.dot_dimension_numbers<[1], [0], [0], [1], [0, 0, 1, 1], [], []>} : vector<1x4xf32>, vector<4x256xf32>, vector<1x256xf32> -> vector<1x256xf32>
    %26 = arith.addf %24, %25 : vector<1x256xf32>
    %27 = vector.broadcast %23 : vector<1x1xf32> to vector<1x256xf32>
    %28 = arith.addf %26, %27 : vector<1x256xf32>
    %c0_24 = arith.constant 0 : index
    %c0_25 = arith.constant 0 : index
    %c0_26 = arith.constant 0 : index
    %29 = vector.load %arg11[%c0_24, %c0_25, %c0_26] : memref<1x1x256xf32, #tpu.memory_space<vmem>>, vector<1x1x256xf32>
    %30 = vector.shape_cast %29 : vector<1x1x256xf32> to vector<1x256xf32>
    %31 = vector.shape_cast %28 : vector<1x256xf32> to vector<1x1x256xf32>
    tpu.vector_store %arg11[%c0_24, %c0_25, %c0_26], %31 {strides = array<i32>} : memref<1x1x256xf32, #tpu.memory_space<vmem>>, vector<1x1x256xf32>,
    return
  }
  func.func @transform_0(%arg0: i32, %arg1: i32) -> (i32, i32, i32) {
    %c0_i32 = arith.constant 0 : i32
    %c0_i32_0 = arith.constant 0 : i32
    return %arg0, %c0_i32, %arg1 : i32, i32, i32
  }
  func.func @transform_1(%arg0: i32, %arg1: i32) -> (i32, i32) {
    %c0_i32 = arith.constant 0 : i32
    %c0_i32_0 = arith.constant 0 : i32
    %c0_i32_1 = arith.constant 0 : i32
    return %c0_i32, %c0_i32_0 : i32, i32
  }
  func.func @transform_2(%arg0: i32, %arg1: i32) -> (i32, i32) {
    %c0_i32 = arith.constant 0 : i32
    %c0_i32_0 = arith.constant 0 : i32
    %c0_i32_1 = arith.constant 0 : i32
    return %c0_i32, %c0_i32_0 : i32, i32
  }
  func.func @transform_3(%arg0: i32, %arg1: i32) -> (i32, i32) {
    %c0_i32 = arith.constant 0 : i32
    %c0_i32_0 = arith.constant 0 : i32
    %c0_i32_1 = arith.constant 0 : i32
    return %c0_i32, %c0_i32_0 : i32, i32
  }
  func.func @transform_4(%arg0: i32, %arg1: i32) -> (i32, i32) {
    %c0_i32 = arith.constant 0 : i32
    %c0_i32_0 = arith.constant 0 : i32
    %c0_i32_1 = arith.constant 0 : i32
    return %c0_i32, %c0_i32_0 : i32, i32
  }
  func.func @transform_5(%arg0: i32, %arg1: i32) -> (i32, i32) {
    %c0_i32 = arith.constant 0 : i32
    %c0_i32_0 = arith.constant 0 : i32
    %c0_i32_1 = arith.constant 0 : i32
    return %c0_i32, %c0_i32_0 : i32, i32
  }
  func.func @transform_6(%arg0: i32, %arg1: i32) -> (i32, i32) {
    %c0_i32 = arith.constant 0 : i32
    %c0_i32_0 = arith.constant 0 : i32
    %c0_i32_1 = arith.constant 0 : i32
    return %c0_i32, %c0_i32_0 : i32, i32
  }
  func.func @transform_7(%arg0: i32, %arg1: i32) -> (i32, i32) {
    %c0_i32 = arith.constant 0 : i32
    %c0_i32_0 = arith.constant 0 : i32
    %c0_i32_1 = arith.constant 0 : i32
    return %c0_i32, %c0_i32_0 : i32, i32
  }
  func.func @transform_8(%arg0: i32, %arg1: i32) -> (i32, i32) {
    %c0_i32 = arith.constant 0 : i32
    %c0_i32_0 = arith.constant 0 : i32
    %c0_i32_1 = arith.constant 0 : i32
    return %c0_i32, %c0_i32_0 : i32, i32
  }
  func.func @transform_9(%arg0: i32, %arg1: i32) -> (i32, i32, i32) {
    %c0_i32 = arith.constant 0 : i32
    %c0_i32_0 = arith.constant 0 : i32
    return %arg0, %c0_i32, %arg1 : i32, i32, i32
  }
}

module attributes {stable_mosaic.version = 11 : i64} {
  func.func @kernel(%arg0: i32, %arg1: i32, %arg2: memref<1x4x256xf32, #tpu.memory_space<vmem>>, %arg3: memref<32x4xf32, #tpu.memory_space<vmem>>, %arg4: memref<32x1xf32, #tpu.memory_space<vmem>>, %arg5: memref<32x32xf32, #tpu.memory_space<vmem>>, %arg6: memref<32x4xf32, #tpu.memory_space<vmem>>, %arg7: memref<32x1xf32, #tpu.memory_space<vmem>>, %arg8: memref<1x32xf32, #tpu.memory_space<vmem>>, %arg9: memref<1x4xf32, #tpu.memory_space<vmem>>, %arg10: memref<1x1xf32, #tpu.memory_space<vmem>>, %arg11: memref<1x1x256xf32, #tpu.memory_space<vmem>>) attributes {dimension_semantics = [#tpu.dimension_semantics<parallel>, #tpu.dimension_semantics<parallel>], iteration_bounds = array<i64: 2, 1>, scalar_prefetch = 0 : i64, scratch_operands = 0 : i64, tpu.core_type = #tpu.core_type<tc>, window_params = [{transform_indices = @transform_0, window_bounds = array<i64: 1, 4, 256>}, {pipeline_mode = #tpu.pipeline_mode<synchronous>, transform_indices = @transform_1, window_bounds = array<i64: 32, 4>}, {pipeline_mode = #tpu.pipeline_mode<synchronous>, transform_indices = @transform_2, window_bounds = array<i64: 32, 1>}, {pipeline_mode = #tpu.pipeline_mode<synchronous>, transform_indices = @transform_3, window_bounds = array<i64: 32, 32>}, {pipeline_mode = #tpu.pipeline_mode<synchronous>, transform_indices = @transform_4, window_bounds = array<i64: 32, 4>}, {pipeline_mode = #tpu.pipeline_mode<synchronous>, transform_indices = @transform_5, window_bounds = array<i64: 32, 1>}, {pipeline_mode = #tpu.pipeline_mode<synchronous>, transform_indices = @transform_6, window_bounds = array<i64: 1, 32>}, {pipeline_mode = #tpu.pipeline_mode<synchronous>, transform_indices = @transform_7, window_bounds = array<i64: 1, 4>}, {pipeline_mode = #tpu.pipeline_mode<synchronous>, transform_indices = @transform_8, window_bounds = array<i64: 1, 1>}, {transform_indices = @transform_9, window_bounds = array<i64: 1, 1, 256>}]} {
    %c0 = arith.constant 0 : index
    %c0_0 = arith.constant 0 : index
    %c0_1 = arith.constant 0 : index
    %0 = vector.load %arg2[%c0, %c0_0, %c0_1] : memref<1x4x256xf32, #tpu.memory_space<vmem>>, vector<1x4x256xf32>
    %1 = vector.shape_cast %0 : vector<1x4x256xf32> to vector<4x256xf32>
    %c0_2 = arith.constant 0 : index
    %c0_3 = arith.constant 0 : index
    %2 = vector.load %arg3[%c0_2, %c0_3] : memref<32x4xf32, #tpu.memory_space<vmem>>, vector<32x4xf32>
    %c0_4 = arith.constant 0 : index
    %c0_5 = arith.constant 0 : index
    %3 = vector.load %arg4[%c0_4, %c0_5] : memref<32x1xf32, #tpu.memory_space<vmem>>, vector<32x1xf32>
    %cst = arith.constant dense<0.000000e+00> : vector<32x256xf32>
    %4 = tpu.matmul %2, %1, %cst {dimension_numbers = #tpu.dot_dimension_numbers<[1], [0], [0], [1], [0, 0, 1, 1], [], []>} : vector<32x4xf32>, vector<4x256xf32>, vector<32x256xf32> -> vector<32x256xf32>
    %5 = vector.broadcast %3 : vector<32x1xf32> to vector<32x256xf32>
    %6 = arith.addf %4, %5 : vector<32x256xf32>
    %cst_6 = arith.constant 0.00999999977 : f32
    %7 = vector.broadcast %cst_6 : f32 to vector<32x256xf32>
    %8 = arith.mulf %6, %7 : vector<32x256xf32>
    %9 = arith.maximumf %6, %8 : vector<32x256xf32>
    %c0_7 = arith.constant 0 : index
    %c0_8 = arith.constant 0 : index
    %10 = vector.load %arg5[%c0_7, %c0_8] : memref<32x32xf32, #tpu.memory_space<vmem>>, vector<32x32xf32>
    %c0_9 = arith.constant 0 : index
    %c0_10 = arith.constant 0 : index
    %11 = vector.load %arg6[%c0_9, %c0_10] : memref<32x4xf32, #tpu.memory_space<vmem>>, vector<32x4xf32>
    %c0_11 = arith.constant 0 : index
    %c0_12 = arith.constant 0 : index
    %12 = vector.load %arg7[%c0_11, %c0_12] : memref<32x1xf32, #tpu.memory_space<vmem>>, vector<32x1xf32>
    %cst_13 = arith.constant dense<0.000000e+00> : vector<32x256xf32>
    %13 = tpu.matmul %10, %9, %cst_13 {dimension_numbers = #tpu.dot_dimension_numbers<[1], [0], [0], [1], [0, 0, 1, 1], [], []>} : vector<32x32xf32>, vector<32x256xf32>, vector<32x256xf32> -> vector<32x256xf32>
    %cst_14 = arith.constant dense<0.000000e+00> : vector<32x256xf32>
    %14 = tpu.matmul %11, %1, %cst_14 {dimension_numbers = #tpu.dot_dimension_numbers<[1], [0], [0], [1], [0, 0, 1, 1], [], []>} : vector<32x4xf32>, vector<4x256xf32>, vector<32x256xf32> -> vector<32x256xf32>
    %15 = arith.addf %13, %14 : vector<32x256xf32>
    %16 = vector.broadcast %12 : vector<32x1xf32> to vector<32x256xf32>
    %17 = arith.addf %15, %16 : vector<32x256xf32>
    %cst_15 = arith.constant 0.00999999977 : f32
    %18 = vector.broadcast %cst_15 : f32 to vector<32x256xf32>
    %19 = arith.mulf %17, %18 : vector<32x256xf32>
    %20 = arith.maximumf %17, %19 : vector<32x256xf32>
    %c0_16 = arith.constant 0 : index
    %c0_17 = arith.constant 0 : index
    %21 = vector.load %arg8[%c0_16, %c0_17] : memref<1x32xf32, #tpu.memory_space<vmem>>, vector<1x32xf32>
    %c0_18 = arith.constant 0 : index
    %c0_19 = arith.constant 0 : index
    %22 = vector.load %arg9[%c0_18, %c0_19] : memref<1x4xf32, #tpu.memory_space<vmem>>, vector<1x4xf32>
    %c0_20 = arith.constant 0 : index
    %c0_21 = arith.constant 0 : index
    %23 = vector.load %arg10[%c0_20, %c0_21] : memref<1x1xf32, #tpu.memory_space<vmem>>, vector<1x1xf32>
    %cst_22 = arith.constant dense<0.000000e+00> : vector<1x256xf32>
    %24 = tpu.matmul %21, %20, %cst_22 {dimension_numbers = #tpu.dot_dimension_numbers<[1], [0], [0], [1], [0, 0, 1, 1], [], []>} : vector<1x32xf32>, vector<32x256xf32>, vector<1x256xf32> -> vector<1x256xf32>
    %cst_23 = arith.constant dense<0.000000e+00> : vector<1x256xf32>
    %25 = tpu.matmul %22, %1, %cst_23 {dimension_numbers = #tpu.dot_dimension_numbers<[1], [0], [0], [1], [0, 0, 1, 1], [], []>} : vector<1x4xf32>, vector<4x256xf32>, vector<1x256xf32> -> vector<1x256xf32>
    %26 = arith.addf %24, %25 : vector<1x256xf32>
    %27 = vector.broadcast %23 : vector<1x1xf32> to vector<1x256xf32>
    %28 = arith.addf %26, %27 : vector<1x256xf32>
    %c0_24 = arith.constant 0 : index
    %c0_25 = arith.constant 0 : index
    %c0_26 = arith.constant 0 : index
    %29 = vector.load %arg11[%c0_24, %c0_25, %c0_26] : memref<1x1x256xf32, #tpu.memory_space<vmem>>, vector<1x1x256xf32>
    %30 = vector.shape_cast %29 : vector<1x1x256xf32> to vector<1x256xf32>
    %31 = vector.shape_cast %28 : vector<1x256xf32> to vector<1x1x256xf32>
    tpu.vector_store %arg11[%c0_24, %c0_25, %c0_26], %31 {strides = array<i32>} : memref<1x1x256xf32, #tpu.memory_space<vmem>>, vector<1x1x256xf32>,
    return
  }
  func.func @transform_0(%arg0: i32, %arg1: i32) -> (i32, i32, i32) {
    %c0_i32 = arith.constant 0 : i32
    %c0_i32_0 = arith.constant 0 : i32
    return %arg0, %c0_i32, %arg1 : i32, i32, i32
  }
  func.func @transform_1(%arg0: i32, %arg1: i32) -> (i32, i32) {
    %c0_i32 = arith.constant 0 : i32
    %c0_i32_0 = arith.constant 0 : i32
    %c0_i32_1 = arith.constant 0 : i32
    return %c0_i32, %c0_i32_0 : i32, i32
  }
  func.func @transform_2(%arg0: i32, %arg1: i32) -> (i32, i32) {
    %c0_i32 = arith.constant 0 : i32
    %c0_i32_0 = arith.constant 0 : i32
    %c0_i32_1 = arith.constant 0 : i32
    return %c0_i32, %c0_i32_0 : i32, i32
  }
  func.func @transform_3(%arg0: i32, %arg1: i32) -> (i32, i32) {
    %c0_i32 = arith.constant 0 : i32
    %c0_i32_0 = arith.constant 0 : i32
    %c0_i32_1 = arith.constant 0 : i32
    return %c0_i32, %c0_i32_0 : i32, i32
  }
  func.func @transform_4(%arg0: i32, %arg1: i32) -> (i32, i32) {
    %c0_i32 = arith.constant 0 : i32
    %c0_i32_0 = arith.constant 0 : i32
    %c0_i32_1 = arith.constant 0 : i32
    return %c0_i32, %c0_i32_0 : i32, i32
  }
  func.func @transform_5(%arg0: i32, %arg1: i32) -> (i32, i32) {
    %c0_i32 = arith.constant 0 : i32
    %c0_i32_0 = arith.constant 0 : i32
    %c0_i32_1 = arith.constant 0 : i32
    return %c0_i32, %c0_i32_0 : i32, i32
  }
  func.func @transform_6(%arg0: i32, %arg1: i32) -> (i32, i32) {
    %c0_i32 = arith.constant 0 : i32
    %c0_i32_0 = arith.constant 0 : i32
    %c0_i32_1 = arith.constant 0 : i32
    return %c0_i32, %c0_i32_0 : i32, i32
  }
  func.func @transform_7(%arg0: i32, %arg1: i32) -> (i32, i32) {
    %c0_i32 = arith.constant 0 : i32
    %c0_i32_0 = arith.constant 0 : i32
    %c0_i32_1 = arith.constant 0 : i32
    return %c0_i32, %c0_i32_0 : i32, i32
  }
  func.func @transform_8(%arg0: i32, %arg1: i32) -> (i32, i32) {
    %c0_i32 = arith.constant 0 : i32
    %c0_i32_0 = arith.constant 0 : i32
    %c0_i32_1 = arith.constant 0 : i32
    return %c0_i32, %c0_i32_0 : i32, i32
  }
  func.func @transform_9(%arg0: i32, %arg1: i32) -> (i32, i32, i32) {
    %c0_i32 = arith.constant 0 : i32
    %c0_i32_0 = arith.constant 0 : i32
    return %arg0, %c0_i32, %arg1 : i32, i32, i32
  }
}

</mosaic_0001>

<bundles_post_ra>
// kernel: tpu_custom_call.1
= control target key start
LH: loop header
LB: loop body
LE: loop exit
PB: predicated region body
PF: predicated region fallthrough
CT: control target
= control target key end

     0   :  { %s1526_s0 = inlined_call_operand.vmem [shape: f32[2,4,256], index: 0, kind: input, shape index: {}]   ;;  %s1527_s1 = inlined_call_operand.vmem [shape: f32[32,4], index: 1, kind: input, shape index: {}]   ;;  %s1528_s2 = inlined_call_operand.vmem [shape: f32[32,1], index: 2, kind: input, shape index: {}]   ;;  %s1529_s3 = inlined_call_operand.vmem [shape: f32[32,32], index: 3, kind: input, shape index: {}]   ;;  %s1530_s4 = inlined_call_operand.vmem [shape: f32[32,4], index: 4, kind: input, shape index: {}]   ;;  %s1531_s5 = inlined_call_operand.vmem [shape: f32[32,1], index: 5, kind: input, shape index: {}]   ;;  %s1532_s6 = inlined_call_operand.vmem [shape: f32[1,32], index: 6, kind: input, shape index: {}]   ;;  %s1533_s7 = inlined_call_operand.vmem [shape: f32[1,4], index: 7, kind: input, shape index: {}]   ;;  %s1534_s8 = inlined_call_operand.<no memory space> [shape: f32[1,1], index: 8, kind: input, shape index: {}]   ;;  %s1535_s9 = inlined_call_operand.hbm [shape: f32[2,1,256], index: 9, kind: output, shape index: {}]  }
   0x1   :  { %v14_v0 = vstv %s1534_s8 }
   0x2   :  { %15 = vst [vmem:[#allocation2] sm:$0x1] %v14_v0 }
   0x3   :  { %16 = vsyncpa [#allocation4], 0 }
   0x4   :  { %18 = vsyncpa [#allocation4 + $0x1], 0  ;;  %s1314_s11 = smov 0   ;;  %s1316_s12 = smov 0  }
   0x5   :  { %s1318_s13 = smov 0   ;;  %s1320_s14 = smov 0  }
   0x6   :  { %s1322_s15 = smov 0   ;;  %s1324_s16 = smov 0  }
   0x7 LB: > { %s1055_s8 = sadd.s32 4294967295, %s1255_s16   ;;  %s1056_s17 = sadd.s32 4294967294, %s1255_s16   ;;  %s1255_s16 = sphi %s1324_s16, %s24_s16   ;;  %s1251_s15 = sphi %s1322_s15, %s1542_s15   ;;  %s1247_s14 = sphi %s1320_s14, %s1541_s14   ;;  %s1243_s13 = sphi %s1318_s13, %s1540_s13   ;;  %s1239_s12 = sphi %s1316_s12, %s1539_s12   ;;  %s1235_s11 = sphi %s1314_s11, %s1538_s11  }
   0x8   : > { %s36_s18 = sadd.s32 1, %s1251_s15  ;;  %s241_s19 = sadd.s32 1, %s1243_s13 }
   0x9   : > { %p38_p0 = scmp.ge.s32.totalorder %s36_s18, 2  ;;  %p251_p1 = scmp.ne.s32.totalorder %s1243_s13, %s1239_s12 }
   0xa   : > { %p252_p2 = scmp.eq.s32.totalorder %s1055_s8, 1  ;;  %p257_p3 = scmp.ne.s32.totalorder %s1239_s12, %s1235_s11 }
   0xb   : > { %s1544_s18 = smov (%p38_p0, %s36_s18), 0  ;;  %p258_p5 = scmp.eq.s32.totalorder %s1056_s17, 1 }
   0xc   : > { %p1354_p4 = por %p252_p2, %p251_p1  ;;  %s236_s21 = ssub.s32 %s1251_s15, %s1544_s18 }
   0xd   : > { %p1059_p6 = scmp.ge.s32.totalorder %s1255_s16, 1  ;;  %p239_p7 = scmp.eq.s32.totalorder %s236_s21, 0 }
   0xe   : > { %p1361_p8 = por %p258_p5, %p257_p3  ;;  %p313_p9 = scmp.lt.s32.totalorder %s1255_s16, 3 }
   0xf   : > { %s1367_s23 = scalar_select %p239_p7, %s1243_s13, %s241_s19  }
  0x10   : > { %p314_p10 = pnand %p1059_p6, %p313_p9 }
  0x11   : > { %p354_p11 = scmp.lt.s32.totalorder (!%p314_p10), %s1247_s14, 1  ;;  %v1257_v1 = vmov (!%p314_p10), 0.0   ;;  %v369_v2 = vld [vmem:[%s1528_s2] sm:$0xff] (!%p314_p10)  ;;  %v1258_v3 = vmov (!%p314_p10), 0   ;;  %v371_v4 = vld [vmem:[%s1528_s2 + $0x10] sm:$0xff] (!%p314_p10)  ;;  %v370_v5 = vld [vmem:[%s1528_s2 + $0x8] sm:$0xff] (!%p314_p10) }
  0x12   : > { %317 = sbr.rel (%p314_p10) target bundleno = 743 (0x2e7), region = 56  ;;  %477 = vmatprep.mubr.f32.mxu0 (!%p314_p10), %v1257_v1  ;;  %606 = vmatprep.mubr.f32.mxu1 (!%p314_p10), %v1257_v1  ;;  %v372_v6 = vld [vmem:[%s1528_s2 + $0x18] sm:$0xff] (!%p314_p10)  ;;  %vm408_vm0 = vcmask (!%p314_p10), 1043456   ;;  %v365_v9 = vld [vmem:[%s1527_s1] sm:$0xff] (!%p314_p10)  ;;  %vm395_vm1 = vcmask (!%p314_p10), 31744   ;;  %v527_v11 = vld [vmem:[%s1531_s5 + $0x8] sm:$0xff] (!%p314_p10) }
  0x13   : > { %1174 = vset.pattern.permute.xlu0 (!%p314_p10), %v1258_v3  ;;  %1175 = vset.pattern.permute.xlu1 (!%p314_p10), %v1258_v3  ;;  %v526_v10 = vld [vmem:[%s1531_s5] sm:$0xff] (!%p314_p10)  ;;  %v366_v12 = vld [vmem:[%s1527_s1 + $0x8] sm:$0xff] (!%p314_p10)  ;;  %v528_v13 = vld [vmem:[%s1531_s5 + $0x10] sm:$0xff] (!%p314_p10)  ;;  %vm631_vm2 = vcmask (!%p314_p10), 261120   ;;  %s350_s25 = sand.u32 (!%p314_p10), 1, %s1239_s12  }
  0x14   : > { %375 = vperm.xlu0 (!%p314_p10), %1174, %v369_v2   ;;  %385 = vperm.xlu1 (!%p314_p10), %1175, %v371_v4   ;;  %v529_v14 = vld [vmem:[%s1531_s5 + $0x18] sm:$0xff] (!%p314_p10)  ;;  %v367_v15 = vld [vmem:[%s1527_s1 + $0x10] sm:$0xff] (!%p314_p10)  ;;  %v779_v16 = vld [vmem:[#allocation2] sm:$0x1] (!%p314_p10)  ;;  %s1060_s27 = sshll.u32 (!%p314_p10), %s350_s25, 1  ;;  %s963_s17 = scalar_lea.sflag (!%p314_p10), [#allocation4], %s350_s25 }
  0x15   : > { %v368_v17 = vld [vmem:[%s1527_s1 + $0x18] sm:$0xff] (!%p314_p10)  ;;  %v522_v18 = vld [vmem:[%s1530_s4] sm:$0xff] (!%p314_p10)  ;;  %v523_v19 = vld [vmem:[%s1530_s4 + $0x8] sm:$0xff] (!%p314_p10)  ;;  %s352_s28 = scalar_lea.vmem (!%p314_p10), [#allocation3], %s1060_s27 }
  0x16   : > { %v524_v20 = vld [vmem:[%s1530_s4 + $0x10] sm:$0xff] (!%p314_p10)  ;;  %v525_v21 = vld [vmem:[%s1530_s4 + $0x18] sm:$0xff] (!%p314_p10)  ;;  %v518_v62 = vld [vmem:[%s1529_s3] sm:$0xff] (!%p314_p10)  ;;  %s979_s30 = sshll.u32 (!%p314_p10), %s352_s28, 4  ;;  %s1481_s30 = int_to_ptr.vmem [resolvable:$true] %s979_s30 }
  0x17   : > { %v519_v63 = vld [vmem:[%s1529_s3 + $0x8] sm:$0xff] (!%p314_p10)  ;;  %v520_v0 = vld [vmem:[%s1529_s3 + $0x10] sm:$0xff] (!%p314_p10)  ;;  %v521_v2 = vld [vmem:[%s1529_s3 + $0x18] sm:$0xff] (!%p314_p10)  ;;  %s1177_s19 = scalar_lea.vmem (!%p314_p10), %s1481_s30, 32 }
  0x18   : > { %380 = vperm.xlu0 (!%p314_p10), %1174, %v370_v5   ;;  %390 = vperm.xlu1 (!%p314_p10), %1175, %v372_v6   ;;  %v778_v3 = vld [vmem:[%s1533_s7] sm:$0x1] (!%p314_p10)  ;;  %p1178_p12 = scmp.ne.s32.totalorder (!%p314_p10), %s1481_s30, %s1177_s19 }
  0x19   : > { %s355_s26 = scalar_select %p354_p11, %s1247_s14, 1 }
  0x1a   : > { %p1179_p13 = pnand %p1178_p12, %p1354_p4 }
  0x1b   : > { %s1088_s29 = sshll.u32 %s355_s26, 3  ;;  %s1089_s26 = sshll.u32 %s1247_s14, 5 }
  0x1c   : > { %s361_s24 = scalar_lea.vmem %s1526_s0, %s1088_s29  ;;  %735 = vperm.xlu0 %1174, %v526_v10   ;;  %740 = vperm.xlu1 %1175, %v527_v11   ;;  %s1479_s8 = scalar_lea.hbm %s1535_s9, %s1089_s26 }
  0x1d   : > { %v364_v7 = vld [vmem:[%s361_s24] sm:$0xff]  ;;  %p1180_p0 = pneg %p1179_p13  ;;  %s1260_s14 = smov [#allocation3]  }
  0x1e   : > { %v394_v8 = vcombine.high %v364_v7, %v364_v7  ;;  %s1181_s21 = sshll.u32 %s1260_s14, 4  ;;  %s1182_s21 = int_to_ptr.vmem [resolvable:$false] %s1181_s21 }
  0x1f   : > { %s1183_s24 = scalar_lea.vmem %s1182_s21, 64  ;;  %p1184_p1 = scmp.lt.s32.totalorder %s1481_s30, %s1182_s21 }
  0x20   : > { %1063 = vmatprep.subr.msk.mxu0 %vm408_vm0, %v394_v8  ;;  %1069 = vmatprep.subr.msk.mxu1 %vm408_vm0, %v394_v8  ;;  %p1185_p2 = scmp.lt.s32.totalorder %s1183_s24, %s1177_s19 }
  0x21   : > { %1064 = vmatpush1.msk.msra.mxu0 %vm408_vm0, %v364_v7  ;;  %1070 = vmatpush1.msk.msra.mxu1 %vm408_vm0, %v364_v7 }
  0x22   : > { %1065 = vmatmul.mubr.msk.f32.vlgmr.msra.gmra.mrb[0].mxu0 %vm395_vm1, %v365_v9  ;;  %1079 = vmatprep.subr.msk.mxu0 %vm408_vm0, %v394_v8  ;;  %p1186_p3 = por %p1185_p2, %p1184_p1 }
  0x23   : > { %483 = vmatprep.mubr.f32.mxu0 %v1257_v1  ;;  %1080 = vmatpush1.msk.msra.mxu0 %vm408_vm0, %v364_v7 }
  0x24   : > { %745 = vperm.xlu0 %1174, %v528_v13   ;;  %750 = vperm.xlu1 %1175, %v529_v14   ;;  %p1187_p5 = pnand %p1186_p3, %p1180_p0 }
  0x25   : > { %1071 = vmatmul.mubr.msk.f32.vlgmr.msra.gmra.mrb[0].mxu1 %vm395_vm1, %v522_v18 }
  0x26   : > { %1066 = vmatmul.mubr.msk.f32.gmra.mrb[2].mxu0 %vm395_vm1, %v366_v12  ;;  %612 = vmatprep.mubr.f32.mxu1 %v1257_v1 }
  0x27   : > { %489 = vmatprep.mubr.f32.mxu0 %v1257_v1 }
  0x28   : > { %930 = vperm.xlu0 %1174, %v779_v16  }
  0x29   : > { %1072 = vmatmul.mubr.msk.f32.gmra.mrb[2].mxu1 %vm395_vm1, %v523_v19 }
  0x2a   : > { %1067 = vmatmul.mubr.msk.f32.gmra.mrb[4].mxu0 %vm395_vm1, %v367_v15  ;;  %618 = vmatprep.mubr.f32.mxu1 %v1257_v1 }
  0x2b   : > { %495 = vmatprep.mubr.f32.mxu0 %v1257_v1 }
  0x2d   : > { %1073 = vmatmul.mubr.msk.f32.gmra.mrb[4].mxu1 %vm395_vm1, %v524_v20 }
  0x2e   : > { %1068 = vmatmul.mubr.msk.f32.gmra.mrb[6].mxu0 %vm395_vm1, %v368_v17  ;;  %624 = vmatprep.mubr.f32.mxu1 %v1257_v1 }
  0x2f   : > { %847 = vmatprep.mubr.f32.mxu0 %v1257_v1 }
  0x31   : > { %1074 = vmatmul.mubr.msk.f32.gmra.mrb[6].mxu1 %vm395_vm1, %v525_v21 }
  0x32   : > { %708 = vmatprep.mubr.f32.mxu1 %v1257_v1  ;;  %1081 = vmatmul.mubr.msk.f32.vlgmr.msra.gmra.mrb[8].mxu0 %vm395_vm1, %v778_v3 }
  0x33   : > { %921 = vmatprep.mubr.f32.mxu0 %v1257_v1 }
  0x93   : > { %v376_v22 = vpop.permute.xlu0 %375  ;;  %v386_v32 = vpop.permute.xlu1 %385 }
  0x97   : > { %v381_v27 = vpop.permute.xlu0 %380  ;;  %v391_v46 = vpop.permute.xlu1 %390 }
  0x9b   : > { %v736_v4 = vpop.permute.xlu0 %735  ;;  %v741_v9 = vpop.permute.xlu1 %740 }
  0xa3   : > { %v746_v17 = vpop.permute.xlu0 %745 }
  0xf5   : > { %v479_v23 = vpop.f32.mrb[0].mxu0 }
  0xf6   : > { %v480_v24 = vadd.f32 %v479_v23, %v376_v22  ;;  %v481_v25 = vpop.f32.mrb[1].mxu0 }
  0xf7   : > { %v482_v26 = vadd.f32 %v481_v25, %v376_v22 }
  0xf8   : > { %v502_v29 = vmul.f32 0.01, %v480_v24 }
  0xf9   : > { %v485_v28 = vpop.f32.mrb[2].mxu0  ;;  %v503_v33 = vmul.f32 0.01, %v482_v26 }
  0xfa   : > { %v486_v30 = vadd.f32 %v485_v28, %v381_v27  ;;  %v487_v31 = vpop.f32.mrb[3].mxu0  ;;  %v510_v38 = vmax.f32 %v480_v24, %v502_v29 }
  0xfb   : > { %v488_v34 = vadd.f32 %v487_v31, %v381_v27  ;;  %v511_v42 = vmax.f32 %v482_v26, %v503_v33  ;;  %v751_v27 = vpop.permute.xlu1 %750 }
  0xfc   : > { %v504_v35 = vmul.f32 0.01, %v486_v30 }
  0xfd   : > { %v505_v36 = vmul.f32 0.01, %v488_v34  ;;  %v491_v37 = vpop.f32.mrb[4].mxu0 }
  0xfe   : > { %v512_v39 = vmax.f32 %v486_v30, %v504_v35  ;;  %v492_v40 = vadd.f32 %v491_v37, %v386_v32  ;;  %v493_v41 = vpop.f32.mrb[5].mxu0 }
  0xff   : > { %v513_v43 = vmax.f32 %v488_v34, %v505_v36  ;;  %v494_v44 = vadd.f32 %v493_v41, %v386_v32 }
 0x100   : > { %v1092_v45 = vpack.c.bf16 %v512_v39, %v510_v38  ;;  %v506_v49 = vmul.f32 0.01, %v492_v40 }
 0x101   : > { %v497_v47 = vpop.f32.mrb[6].mxu0  ;;  %v1090_v48 = vpack.c.bf16 %v513_v43, %v511_v42  ;;  %v507_v52 = vmul.f32 0.01, %v494_v44  ;;  %v777_v43 = vld [vmem:[%s1532_s6] sm:$0x1] }
 0x102   : > { %v498_v50 = vadd.f32 %v497_v47, %v391_v46  ;;  %v499_v51 = vpop.f32.mrb[7].mxu0  ;;  %v514_v56 = vmax.f32 %v492_v40, %v506_v49  ;;  %v931_v49 = vpop.permute.xlu0 %930 }
 0x103   : > { %v500_v53 = vadd.f32 %v499_v51, %v391_v46  ;;  %1091 = vmatprep.subr.bf16.mxu1 %v1090_v48  ;;  %v515_v58 = vmax.f32 %v494_v44, %v507_v52  ;;  %v933_v44 = vlaneseq  ;;  %v1259_v46 = vmov 1966171168  }
 0x104   : > { %v508_v54 = vmul.f32 0.01, %v498_v50  ;;  %1093 = vmatpush1.bf16.msra.mxu1 %v1092_v45  ;;  %v943_v47 = vunpack.c.l.s4 %v1259_v46 }
 0x105   : > { %v509_v55 = vmul.f32 0.01, %v500_v53  ;;  %v934_v45 = vshrl.u32 %v933_v44, 7  ;;  %vm959_vm3 = vcmp.lt.s32.totalorder %v933_v44, 256 }
 0x106   : > { %v516_v57 = vmax.f32 %v498_v50, %v508_v54  ;;  %v944_v50 = vunpack.c.0.s8 %v943_v47 }
 0x107   : > { %v517_v59 = vmax.f32 %v500_v53, %v509_v55  ;;  %v935_v48 = vsub.s32 0, %v934_v45 }
 0x108   : > { %v1096_v60 = vpack.c.bf16 %v516_v57, %v514_v56  ;;  %v947_v56 = vsub.s32 %v944_v50, %v934_v45 }
 0x109   : > { %v1094_v61 = vpack.c.bf16 %v517_v59, %v515_v58  ;;  %v936_v51 = vrot.slane %v931_v49, %v935_v48 }
 0x10b   : > { %1095 = vmatprep.subr.bf16.mxu1 %v1094_v61 }
 0x10c   : > { %1097 = vmatpush1.bf16.msra.mxu1 %v1096_v60 }
 0x10f   : > { %1075 = vmatmul.mubr.msk.f32.vlgmr.msra.gmra.mrb[0].mxu1 %vm631_vm2, %v518_v62 }
 0x110   : > { %714 = vmatprep.mubr.f32.mxu1 %v1257_v1 }
 0x113   : > { %1076 = vmatmul.mubr.msk.f32.gmra.mrb[2].mxu1 %vm631_vm2, %v519_v63 }
 0x114   : > { %720 = vmatprep.mubr.f32.mxu1 %v1257_v1 }
 0x117   : > { %1077 = vmatmul.mubr.msk.f32.gmra.mrb[4].mxu1 %vm631_vm2, %v520_v0 }
 0x118   : > { %726 = vmatprep.mubr.f32.mxu1 %v1257_v1 }
 0x11b   : > { %1078 = vmatmul.mubr.msk.f32.gmra.mrb[6].mxu1 %vm631_vm2, %v521_v2 }
 0x1e2   : > { %v710_v5 = vpop.f32.mrb[0].mxu1 }
 0x1e3   : > { %v753_v6 = vadd.f32 %v736_v4, %v710_v5  ;;  %v712_v7 = vpop.f32.mrb[1].mxu1 }
 0x1e4   : > { %v754_v8 = vadd.f32 %v736_v4, %v712_v7 }
 0x1e5   : > { %v761_v11 = vmul.f32 0.01, %v753_v6 }
 0x1e6   : > { %v716_v10 = vpop.f32.mrb[2].mxu1  ;;  %v762_v14 = vmul.f32 0.01, %v754_v8 }
 0x1e7   : > { %v755_v12 = vadd.f32 %v741_v9, %v716_v10  ;;  %v718_v13 = vpop.f32.mrb[3].mxu1  ;;  %v769_v20 = vmax.f32 %v753_v6, %v761_v11 }
 0x1e8   : > { %v756_v15 = vadd.f32 %v741_v9, %v718_v13  ;;  %v770_v23 = vmax.f32 %v754_v8, %v762_v14 }
 0x1e9   : > { %v763_v16 = vmul.f32 0.01, %v755_v12 }
 0x1ea   : > { %v764_v18 = vmul.f32 0.01, %v756_v15  ;;  %v722_v19 = vpop.f32.mrb[4].mxu1 }
 0x1eb   : > { %v771_v21 = vmax.f32 %v755_v12, %v763_v16  ;;  %v757_v22 = vadd.f32 %v746_v17, %v722_v19  ;;  %v724_v1 = vpop.f32.mrb[5].mxu1 }
 0x1ec   : > { %v772_v24 = vmax.f32 %v756_v15, %v764_v18  ;;  %v758_v25 = vadd.f32 %v746_v17, %v724_v1 }
 0x1ed   : > { %v1100_v26 = vpack.c.bf16 %v771_v21, %v769_v20  ;;  %v765_v30 = vmul.f32 0.01, %v757_v22 }
 0x1ee   : > { %v728_v28 = vpop.f32.mrb[6].mxu1  ;;  %v1098_v29 = vpack.c.bf16 %v772_v24, %v770_v23  ;;  %v766_v33 = vmul.f32 0.01, %v758_v25 }
 0x1ef   : > { %v759_v31 = vadd.f32 %v751_v27, %v728_v28  ;;  %v730_v32 = vpop.f32.mrb[7].mxu1  ;;  %v773_v37 = vmax.f32 %v757_v22, %v765_v30 }
 0x1f0   : > { %v760_v34 = vadd.f32 %v751_v27, %v730_v32  ;;  %1099 = vmatprep.subr.bf16.mxu0 %v1098_v29  ;;  %v774_v39 = vmax.f32 %v758_v25, %v766_v33 }
 0x1f1   : > { %v767_v35 = vmul.f32 0.01, %v759_v31  ;;  %1101 = vmatpush1.bf16.msra.mxu0 %v1100_v26 }
 0x1f2   : > { %v768_v36 = vmul.f32 0.01, %v760_v34 }
 0x1f3   : > { %v775_v38 = vmax.f32 %v759_v31, %v767_v35 }
 0x1f4   : > { %v776_v40 = vmax.f32 %v760_v34, %v768_v36 }
 0x1f5   : > { %v1104_v41 = vpack.c.bf16 %v775_v38, %v773_v37 }
 0x1f6   : > { %v1102_v42 = vpack.c.bf16 %v776_v40, %v774_v39 }
 0x1f8   : > { %1103 = vmatprep.subr.bf16.mxu0 %v1102_v42 }
 0x1f9   : > { %1105 = vmatpush1.bf16.msra.mxu0 %v1104_v41 }
 0x1fc   : > { %1082 = vmatmul.mubr.msk.f32.vlgmr.msra.gmra.mrb[8].mxu0 %vm631_vm2, %v777_v43 }
 0x2cf   : > { %v923_v52 = vpop.f32.mrb[8].mxu0 }
 0x2d0   : > { %v937_v53 = vadd.f32 %v936_v51, %v923_v52  ;;  %v925_v54 = vpop.f32.mrb[9].mxu0 }
 0x2d1   : > { %v938_v55 = vadd.f32 %v936_v51, %v925_v54 }
 0x2d3   : > { %v941_v57 = vcombine.low %v937_v53, %v938_v55 }
 0x2d5   : > { %v948_v58 = vrot.slane %v941_v57, %v947_v56 }
 0x2d7   : > { %v955_v59 = vrot.slane %v948_v58, %v947_v56 }
 0x2d9   : > { %961 = vst.msk [vmem:[%s352_s28] sm:$0x3] %vm959_vm3, %v955_v59 }
 0x2da   : > { %1190 = shalt.err (!%p1187_p5)
}
 0x2db   : > { %s1191_s25 = scalar_lea.hbm %s1479_s8, 32  ;;  %s1195_s28 = scalar_lea.hbm %s1535_s9, 64 }
 0x2dc   : > { %p1192_p6 = scmp.ne.s32.totalorder %s1479_s8, %s1191_s25  ;;  %p1196_p10 = scmp.lt.u32.totalorder %s1479_s8, %s1535_s9 }
 0x2dd   : > { %p1197_p11 = scmp.lt.u32.totalorder %s1195_s28, %s1191_s25  ;;  %p1199_p13 = scmp.lt.u32.totalorder %s1191_s25, %s1479_s8 }
 0x2de   : > { %p1193_p7 = pnand %p1192_p6, %p1354_p4 }
 0x2df   : > { %p1198_p12 = por %p1197_p11, %p1196_p10 }
 0x2e0   : > { %p1194_p9 = pneg %p1193_p7 }
 0x2e1   : > { %p1200_p0 = por %p1199_p13, %p1198_p12 }
 0x2e3   : > { %p1201_p1 = pnand %p1200_p0, %p1194_p9 }
 0x2e5   : > { %1204 = shalt.err (!%p1201_p1)
}
 0x2e6   : > { %1116 = dma.vmem_to_hbm [thread:$0]  (%p1354_p4), %s1481_s30, 32, %s1479_s8, %s963_s17  }
 0x2e7 PF: > { %p1122_p2 = scmp.ge.s32.totalorder %s1255_s16, 2  ;;  %s991_s19 = sand.u32 1, %s1235_s11  }
 0x2e8   : > { %s992_s14 = scalar_lea.sflag [#allocation4], %s991_s19 }
 0x2e9   : > { %p1119_p3 = pnand %p1122_p2, %p1361_p8 }
 0x2eb   : > { %1230 = dma.done.wait (!%p1119_p3), %s992_s14, 32  }
 0x2ec   : > { %1232 = vsyncadd (!%p1119_p3), %s992_s14, 4294967264  ;;  %s24_s16 = sadd.s32 1, %s1255_s16   ;;  %s1538_s11 = smov %s1239_s12 }
 0x2ed   : > { %p21_p5 = scmp.ge.s32.totalorder %s24_s16, 4   ;;  %s1539_s12 = smov %s1243_s13 }
 0x2ee   : > { %s1540_s13 = smov %s1367_s23  ;;  %s1541_s14 = smov %s1251_s15 }
 0x2ef   : > { %s1542_s15 = smov %s1544_s18  ;;  %23 = sbr.rel (!%p21_p5) target bundleno = 7 (0x7), region = 91 }
 0x2f6   :  { %997 = vsyncpa [#allocation4], 1 }
 0x2f7   :  { %999 = vsyncpa [#allocation4 + $0x1], 1 }

// kernel: tpu_custom_call.1
= control target key start
LH: loop header
LB: loop body
LE: loop exit
PB: predicated region body
PF: predicated region fallthrough
CT: control target
= control target key end

     0   :  { %s1526_s0 = inlined_call_operand.vmem [shape: f32[2,4,256], index: 0, kind: input, shape index: {}]   ;;  %s1527_s1 = inlined_call_operand.vmem [shape: f32[32,4], index: 1, kind: input, shape index: {}]   ;;  %s1528_s2 = inlined_call_operand.vmem [shape: f32[32,1], index: 2, kind: input, shape index: {}]   ;;  %s1529_s3 = inlined_call_operand.vmem [shape: f32[32,32], index: 3, kind: input, shape index: {}]   ;;  %s1530_s4 = inlined_call_operand.vmem [shape: f32[32,4], index: 4, kind: input, shape index: {}]   ;;  %s1531_s5 = inlined_call_operand.vmem [shape: f32[32,1], index: 5, kind: input, shape index: {}]   ;;  %s1532_s6 = inlined_call_operand.vmem [shape: f32[1,32], index: 6, kind: input, shape index: {}]   ;;  %s1533_s7 = inlined_call_operand.vmem [shape: f32[1,4], index: 7, kind: input, shape index: {}]   ;;  %s1534_s8 = inlined_call_operand.<no memory space> [shape: f32[1,1], index: 8, kind: input, shape index: {}]   ;;  %s1535_s9 = inlined_call_operand.hbm [shape: f32[2,1,256], index: 9, kind: output, shape index: {}]  }
   0x1   :  { %v14_v0 = vstv %s1534_s8 }
   0x2   :  { %15 = vst [vmem:[#allocation2] sm:$0x1] %v14_v0 }
   0x3   :  { %16 = vsyncpa [#allocation4], 0 }
   0x4   :  { %18 = vsyncpa [#allocation4 + $0x1], 0  ;;  %s1314_s11 = smov 0   ;;  %s1316_s12 = smov 0  }
   0x5   :  { %s1318_s13 = smov 0   ;;  %s1320_s14 = smov 0  }
   0x6   :  { %s1322_s15 = smov 0   ;;  %s1324_s16 = smov 0  }
   0x7 LB: > { %s1055_s8 = sadd.s32 4294967295, %s1255_s16   ;;  %s1056_s17 = sadd.s32 4294967294, %s1255_s16   ;;  %s1255_s16 = sphi %s1324_s16, %s24_s16   ;;  %s1251_s15 = sphi %s1322_s15, %s1542_s15   ;;  %s1247_s14 = sphi %s1320_s14, %s1541_s14   ;;  %s1243_s13 = sphi %s1318_s13, %s1540_s13   ;;  %s1239_s12 = sphi %s1316_s12, %s1539_s12   ;;  %s1235_s11 = sphi %s1314_s11, %s1538_s11  }
   0x8   : > { %s36_s18 = sadd.s32 1, %s1251_s15  ;;  %s241_s19 = sadd.s32 1, %s1243_s13 }
   0x9   : > { %p38_p0 = scmp.ge.s32.totalorder %s36_s18, 2  ;;  %p251_p1 = scmp.ne.s32.totalorder %s1243_s13, %s1239_s12 }
   0xa   : > { %p252_p2 = scmp.eq.s32.totalorder %s1055_s8, 1  ;;  %p257_p3 = scmp.ne.s32.totalorder %s1239_s12, %s1235_s11 }
   0xb   : > { %s1544_s18 = smov (%p38_p0, %s36_s18), 0  ;;  %p258_p5 = scmp.eq.s32.totalorder %s1056_s17, 1 }
   0xc   : > { %p1354_p4 = por %p252_p2, %p251_p1  ;;  %s236_s21 = ssub.s32 %s1251_s15, %s1544_s18 }
   0xd   : > { %p1059_p6 = scmp.ge.s32.totalorder %s1255_s16, 1  ;;  %p239_p7 = scmp.eq.s32.totalorder %s236_s21, 0 }
   0xe   : > { %p1361_p8 = por %p258_p5, %p257_p3  ;;  %p313_p9 = scmp.lt.s32.totalorder %s1255_s16, 3 }
   0xf   : > { %s1367_s23 = scalar_select %p239_p7, %s1243_s13, %s241_s19  }
  0x10   : > { %p314_p10 = pnand %p1059_p6, %p313_p9 }
  0x11   : > { %p354_p11 = scmp.lt.s32.totalorder (!%p314_p10), %s1247_s14, 1  ;;  %v1257_v1 = vmov (!%p314_p10), 0.0   ;;  %v369_v2 = vld [vmem:[%s1528_s2] sm:$0xff] (!%p314_p10)  ;;  %v1258_v3 = vmov (!%p314_p10), 0   ;;  %v371_v4 = vld [vmem:[%s1528_s2 + $0x10] sm:$0xff] (!%p314_p10)  ;;  %v370_v5 = vld [vmem:[%s1528_s2 + $0x8] sm:$0xff] (!%p314_p10) }
  0x12   : > { %317 = sbr.rel (%p314_p10) target bundleno = 743 (0x2e7), region = 56  ;;  %477 = vmatprep.mubr.f32.mxu0 (!%p314_p10), %v1257_v1  ;;  %606 = vmatprep.mubr.f32.mxu1 (!%p314_p10), %v1257_v1  ;;  %v372_v6 = vld [vmem:[%s1528_s2 + $0x18] sm:$0xff] (!%p314_p10)  ;;  %vm408_vm0 = vcmask (!%p314_p10), 1043456   ;;  %v365_v9 = vld [vmem:[%s1527_s1] sm:$0xff] (!%p314_p10)  ;;  %vm395_vm1 = vcmask (!%p314_p10), 31744   ;;  %v527_v11 = vld [vmem:[%s1531_s5 + $0x8] sm:$0xff] (!%p314_p10) }
  0x13   : > { %1174 = vset.pattern.permute.xlu0 (!%p314_p10), %v1258_v3  ;;  %1175 = vset.pattern.permute.xlu1 (!%p314_p10), %v1258_v3  ;;  %v526_v10 = vld [vmem:[%s1531_s5] sm:$0xff] (!%p314_p10)  ;;  %v366_v12 = vld [vmem:[%s1527_s1 + $0x8] sm:$0xff] (!%p314_p10)  ;;  %v528_v13 = vld [vmem:[%s1531_s5 + $0x10] sm:$0xff] (!%p314_p10)  ;;  %vm631_vm2 = vcmask (!%p314_p10), 261120   ;;  %s350_s25 = sand.u32 (!%p314_p10), 1, %s1239_s12  }
  0x14   : > { %375 = vperm.xlu0 (!%p314_p10), %1174, %v369_v2   ;;  %385 = vperm.xlu1 (!%p314_p10), %1175, %v371_v4   ;;  %v529_v14 = vld [vmem:[%s1531_s5 + $0x18] sm:$0xff] (!%p314_p10)  ;;  %v367_v15 = vld [vmem:[%s1527_s1 + $0x10] sm:$0xff] (!%p314_p10)  ;;  %v779_v16 = vld [vmem:[#allocation2] sm:$0x1] (!%p314_p10)  ;;  %s1060_s27 = sshll.u32 (!%p314_p10), %s350_s25, 1  ;;  %s963_s17 = scalar_lea.sflag (!%p314_p10), [#allocation4], %s350_s25 }
  0x15   : > { %v368_v17 = vld [vmem:[%s1527_s1 + $0x18] sm:$0xff] (!%p314_p10)  ;;  %v522_v18 = vld [vmem:[%s1530_s4] sm:$0xff] (!%p314_p10)  ;;  %v523_v19 = vld [vmem:[%s1530_s4 + $0x8] sm:$0xff] (!%p314_p10)  ;;  %s352_s28 = scalar_lea.vmem (!%p314_p10), [#allocation3], %s1060_s27 }
  0x16   : > { %v524_v20 = vld [vmem:[%s1530_s4 + $0x10] sm:$0xff] (!%p314_p10)  ;;  %v525_v21 = vld [vmem:[%s1530_s4 + $0x18] sm:$0xff] (!%p314_p10)  ;;  %v518_v62 = vld [vmem:[%s1529_s3] sm:$0xff] (!%p314_p10)  ;;  %s979_s30 = sshll.u32 (!%p314_p10), %s352_s28, 4  ;;  %s1481_s30 = int_to_ptr.vmem [resolvable:$true] %s979_s30 }
  0x17   : > { %v519_v63 = vld [vmem:[%s1529_s3 + $0x8] sm:$0xff] (!%p314_p10)  ;;  %v520_v0 = vld [vmem:[%s1529_s3 + $0x10] sm:$0xff] (!%p314_p10)  ;;  %v521_v2 = vld [vmem:[%s1529_s3 + $0x18] sm:$0xff] (!%p314_p10)  ;;  %s1177_s19 = scalar_lea.vmem (!%p314_p10), %s1481_s30, 32 }
  0x18   : > { %380 = vperm.xlu0 (!%p314_p10), %1174, %v370_v5   ;;  %390 = vperm.xlu1 (!%p314_p10), %1175, %v372_v6   ;;  %v778_v3 = vld [vmem:[%s1533_s7] sm:$0x1] (!%p314_p10)  ;;  %p1178_p12 = scmp.ne.s32.totalorder (!%p314_p10), %s1481_s30, %s1177_s19 }
  0x19   : > { %s355_s26 = scalar_select %p354_p11, %s1247_s14, 1 }
  0x1a   : > { %p1179_p13 = pnand %p1178_p12, %p1354_p4 }
  0x1b   : > { %s1088_s29 = sshll.u32 %s355_s26, 3  ;;  %s1089_s26 = sshll.u32 %s1247_s14, 5 }
  0x1c   : > { %s361_s24 = scalar_lea.vmem %s1526_s0, %s1088_s29  ;;  %735 = vperm.xlu0 %1174, %v526_v10   ;;  %740 = vperm.xlu1 %1175, %v527_v11   ;;  %s1479_s8 = scalar_lea.hbm %s1535_s9, %s1089_s26 }
  0x1d   : > { %v364_v7 = vld [vmem:[%s361_s24] sm:$0xff]  ;;  %p1180_p0 = pneg %p1179_p13  ;;  %s1260_s14 = smov [#allocation3]  }
  0x1e   : > { %v394_v8 = vcombine.high %v364_v7, %v364_v7  ;;  %s1181_s21 = sshll.u32 %s1260_s14, 4  ;;  %s1182_s21 = int_to_ptr.vmem [resolvable:$false] %s1181_s21 }
  0x1f   : > { %s1183_s24 = scalar_lea.vmem %s1182_s21, 64  ;;  %p1184_p1 = scmp.lt.s32.totalorder %s1481_s30, %s1182_s21 }
  0x20   : > { %1063 = vmatprep.subr.msk.mxu0 %vm408_vm0, %v394_v8  ;;  %1069 = vmatprep.subr.msk.mxu1 %vm408_vm0, %v394_v8  ;;  %p1185_p2 = scmp.lt.s32.totalorder %s1183_s24, %s1177_s19 }
  0x21   : > { %1064 = vmatpush1.msk.msra.mxu0 %vm408_vm0, %v364_v7  ;;  %1070 = vmatpush1.msk.msra.mxu1 %vm408_vm0, %v364_v7 }
  0x22   : > { %1065 = vmatmul.mubr.msk.f32.vlgmr.msra.gmra.mrb[0].mxu0 %vm395_vm1, %v365_v9  ;;  %1079 = vmatprep.subr.msk.mxu0 %vm408_vm0, %v394_v8  ;;  %p1186_p3 = por %p1185_p2, %p1184_p1 }
  0x23   : > { %483 = vmatprep.mubr.f32.mxu0 %v1257_v1  ;;  %1080 = vmatpush1.msk.msra.mxu0 %vm408_vm0, %v364_v7 }
  0x24   : > { %745 = vperm.xlu0 %1174, %v528_v13   ;;  %750 = vperm.xlu1 %1175, %v529_v14   ;;  %p1187_p5 = pnand %p1186_p3, %p1180_p0 }
  0x25   : > { %1071 = vmatmul.mubr.msk.f32.vlgmr.msra.gmra.mrb[0].mxu1 %vm395_vm1, %v522_v18 }
  0x26   : > { %1066 = vmatmul.mubr.msk.f32.gmra.mrb[2].mxu0 %vm395_vm1, %v366_v12  ;;  %612 = vmatprep.mubr.f32.mxu1 %v1257_v1 }
  0x27   : > { %489 = vmatprep.mubr.f32.mxu0 %v1257_v1 }
  0x28   : > { %930 = vperm.xlu0 %1174, %v779_v16  }
  0x29   : > { %1072 = vmatmul.mubr.msk.f32.gmra.mrb[2].mxu1 %vm395_vm1, %v523_v19 }
  0x2a   : > { %1067 = vmatmul.mubr.msk.f32.gmra.mrb[4].mxu0 %vm395_vm1, %v367_v15  ;;  %618 = vmatprep.mubr.f32.mxu1 %v1257_v1 }
  0x2b   : > { %495 = vmatprep.mubr.f32.mxu0 %v1257_v1 }
  0x2d   : > { %1073 = vmatmul.mubr.msk.f32.gmra.mrb[4].mxu1 %vm395_vm1, %v524_v20 }
  0x2e   : > { %1068 = vmatmul.mubr.msk.f32.gmra.mrb[6].mxu0 %vm395_vm1, %v368_v17  ;;  %624 = vmatprep.mubr.f32.mxu1 %v1257_v1 }
  0x2f   : > { %847 = vmatprep.mubr.f32.mxu0 %v1257_v1 }
  0x31   : > { %1074 = vmatmul.mubr.msk.f32.gmra.mrb[6].mxu1 %vm395_vm1, %v525_v21 }
  0x32   : > { %708 = vmatprep.mubr.f32.mxu1 %v1257_v1  ;;  %1081 = vmatmul.mubr.msk.f32.vlgmr.msra.gmra.mrb[8].mxu0 %vm395_vm1, %v778_v3 }
  0x33   : > { %921 = vmatprep.mubr.f32.mxu0 %v1257_v1 }
  0x93   : > { %v376_v22 = vpop.permute.xlu0 %375  ;;  %v386_v32 = vpop.permute.xlu1 %385 }
  0x97   : > { %v381_v27 = vpop.permute.xlu0 %380  ;;  %v391_v46 = vpop.permute.xlu1 %390 }
  0x9b   : > { %v736_v4 = vpop.permute.xlu0 %735  ;;  %v741_v9 = vpop.permute.xlu1 %740 }
  0xa3   : > { %v746_v17 = vpop.permute.xlu0 %745 }
  0xf5   : > { %v479_v23 = vpop.f32.mrb[0].mxu0 }
  0xf6   : > { %v480_v24 = vadd.f32 %v479_v23, %v376_v22  ;;  %v481_v25 = vpop.f32.mrb[1].mxu0 }
  0xf7   : > { %v482_v26 = vadd.f32 %v481_v25, %v376_v22 }
  0xf8   : > { %v502_v29 = vmul.f32 0.01, %v480_v24 }
  0xf9   : > { %v485_v28 = vpop.f32.mrb[2].mxu0  ;;  %v503_v33 = vmul.f32 0.01, %v482_v26 }
  0xfa   : > { %v486_v30 = vadd.f32 %v485_v28, %v381_v27  ;;  %v487_v31 = vpop.f32.mrb[3].mxu0  ;;  %v510_v38 = vmax.f32 %v480_v24, %v502_v29 }
  0xfb   : > { %v488_v34 = vadd.f32 %v487_v31, %v381_v27  ;;  %v511_v42 = vmax.f32 %v482_v26, %v503_v33  ;;  %v751_v27 = vpop.permute.xlu1 %750 }
  0xfc   : > { %v504_v35 = vmul.f32 0.01, %v486_v30 }
  0xfd   : > { %v505_v36 = vmul.f32 0.01, %v488_v34  ;;  %v491_v37 = vpop.f32.mrb[4].mxu0 }
  0xfe   : > { %v512_v39 = vmax.f32 %v486_v30, %v504_v35  ;;  %v492_v40 = vadd.f32 %v491_v37, %v386_v32  ;;  %v493_v41 = vpop.f32.mrb[5].mxu0 }
  0xff   : > { %v513_v43 = vmax.f32 %v488_v34, %v505_v36  ;;  %v494_v44 = vadd.f32 %v493_v41, %v386_v32 }
 0x100   : > { %v1092_v45 = vpack.c.bf16 %v512_v39, %v510_v38  ;;  %v506_v49 = vmul.f32 0.01, %v492_v40 }
 0x101   : > { %v497_v47 = vpop.f32.mrb[6].mxu0  ;;  %v1090_v48 = vpack.c.bf16 %v513_v43, %v511_v42  ;;  %v507_v52 = vmul.f32 0.01, %v494_v44  ;;  %v777_v43 = vld [vmem:[%s1532_s6] sm:$0x1] }
 0x102   : > { %v498_v50 = vadd.f32 %v497_v47, %v391_v46  ;;  %v499_v51 = vpop.f32.mrb[7].mxu0  ;;  %v514_v56 = vmax.f32 %v492_v40, %v506_v49  ;;  %v931_v49 = vpop.permute.xlu0 %930 }
 0x103   : > { %v500_v53 = vadd.f32 %v499_v51, %v391_v46  ;;  %1091 = vmatprep.subr.bf16.mxu1 %v1090_v48  ;;  %v515_v58 = vmax.f32 %v494_v44, %v507_v52  ;;  %v933_v44 = vlaneseq  ;;  %v1259_v46 = vmov 1966171168  }
 0x104   : > { %v508_v54 = vmul.f32 0.01, %v498_v50  ;;  %1093 = vmatpush1.bf16.msra.mxu1 %v1092_v45  ;;  %v943_v47 = vunpack.c.l.s4 %v1259_v46 }
 0x105   : > { %v509_v55 = vmul.f32 0.01, %v500_v53  ;;  %v934_v45 = vshrl.u32 %v933_v44, 7  ;;  %vm959_vm3 = vcmp.lt.s32.totalorder %v933_v44, 256 }
 0x106   : > { %v516_v57 = vmax.f32 %v498_v50, %v508_v54  ;;  %v944_v50 = vunpack.c.0.s8 %v943_v47 }
 0x107   : > { %v517_v59 = vmax.f32 %v500_v53, %v509_v55  ;;  %v935_v48 = vsub.s32 0, %v934_v45 }
 0x108   : > { %v1096_v60 = vpack.c.bf16 %v516_v57, %v514_v56  ;;  %v947_v56 = vsub.s32 %v944_v50, %v934_v45 }
 0x109   : > { %v1094_v61 = vpack.c.bf16 %v517_v59, %v515_v58  ;;  %v936_v51 = vrot.slane %v931_v49, %v935_v48 }
 0x10b   : > { %1095 = vmatprep.subr.bf16.mxu1 %v1094_v61 }
 0x10c   : > { %1097 = vmatpush1.bf16.msra.mxu1 %v1096_v60 }
 0x10f   : > { %1075 = vmatmul.mubr.msk.f32.vlgmr.msra.gmra.mrb[0].mxu1 %vm631_vm2, %v518_v62 }
 0x110   : > { %714 = vmatprep.mubr.f32.mxu1 %v1257_v1 }
 0x113   : > { %1076 = vmatmul.mubr.msk.f32.gmra.mrb[2].mxu1 %vm631_vm2, %v519_v63 }
 0x114   : > { %720 = vmatprep.mubr.f32.mxu1 %v1257_v1 }
 0x117   : > { %1077 = vmatmul.mubr.msk.f32.gmra.mrb[4].mxu1 %vm631_vm2, %v520_v0 }
 0x118   : > { %726 = vmatprep.mubr.f32.mxu1 %v1257_v1 }
 0x11b   : > { %1078 = vmatmul.mubr.msk.f32.gmra.mrb[6].mxu1 %vm631_vm2, %v521_v2 }
 0x1e2   : > { %v710_v5 = vpop.f32.mrb[0].mxu1 }
 0x1e3   : > { %v753_v6 = vadd.f32 %v736_v4, %v710_v5  ;;  %v712_v7 = vpop.f32.mrb[1].mxu1 }
 0x1e4   : > { %v754_v8 = vadd.f32 %v736_v4, %v712_v7 }
 0x1e5   : > { %v761_v11 = vmul.f32 0.01, %v753_v6 }
 0x1e6   : > { %v716_v10 = vpop.f32.mrb[2].mxu1  ;;  %v762_v14 = vmul.f32 0.01, %v754_v8 }
 0x1e7   : > { %v755_v12 = vadd.f32 %v741_v9, %v716_v10  ;;  %v718_v13 = vpop.f32.mrb[3].mxu1  ;;  %v769_v20 = vmax.f32 %v753_v6, %v761_v11 }
 0x1e8   : > { %v756_v15 = vadd.f32 %v741_v9, %v718_v13  ;;  %v770_v23 = vmax.f32 %v754_v8, %v762_v14 }
 0x1e9   : > { %v763_v16 = vmul.f32 0.01, %v755_v12 }
 0x1ea   : > { %v764_v18 = vmul.f32 0.01, %v756_v15  ;;  %v722_v19 = vpop.f32.mrb[4].mxu1 }
 0x1eb   : > { %v771_v21 = vmax.f32 %v755_v12, %v763_v16  ;;  %v757_v22 = vadd.f32 %v746_v17, %v722_v19  ;;  %v724_v1 = vpop.f32.mrb[5].mxu1 }
 0x1ec   : > { %v772_v24 = vmax.f32 %v756_v15, %v764_v18  ;;  %v758_v25 = vadd.f32 %v746_v17, %v724_v1 }
 0x1ed   : > { %v1100_v26 = vpack.c.bf16 %v771_v21, %v769_v20  ;;  %v765_v30 = vmul.f32 0.01, %v757_v22 }
 0x1ee   : > { %v728_v28 = vpop.f32.mrb[6].mxu1  ;;  %v1098_v29 = vpack.c.bf16 %v772_v24, %v770_v23  ;;  %v766_v33 = vmul.f32 0.01, %v758_v25 }
 0x1ef   : > { %v759_v31 = vadd.f32 %v751_v27, %v728_v28  ;;  %v730_v32 = vpop.f32.mrb[7].mxu1  ;;  %v773_v37 = vmax.f32 %v757_v22, %v765_v30 }
 0x1f0   : > { %v760_v34 = vadd.f32 %v751_v27, %v730_v32  ;;  %1099 = vmatprep.subr.bf16.mxu0 %v1098_v29  ;;  %v774_v39 = vmax.f32 %v758_v25, %v766_v33 }
 0x1f1   : > { %v767_v35 = vmul.f32 0.01, %v759_v31  ;;  %1101 = vmatpush1.bf16.msra.mxu0 %v1100_v26 }
 0x1f2   : > { %v768_v36 = vmul.f32 0.01, %v760_v34 }
 0x1f3   : > { %v775_v38 = vmax.f32 %v759_v31, %v767_v35 }
 0x1f4   : > { %v776_v40 = vmax.f32 %v760_v34, %v768_v36 }
 0x1f5   : > { %v1104_v41 = vpack.c.bf16 %v775_v38, %v773_v37 }
 0x1f6   : > { %v1102_v42 = vpack.c.bf16 %v776_v40, %v774_v39 }
 0x1f8   : > { %1103 = vmatprep.subr.bf16.mxu0 %v1102_v42 }
 0x1f9   : > { %1105 = vmatpush1.bf16.msra.mxu0 %v1104_v41 }
 0x1fc   : > { %1082 = vmatmul.mubr.msk.f32.vlgmr.msra.gmra.mrb[8].mxu0 %vm631_vm2, %v777_v43 }
 0x2cf   : > { %v923_v52 = vpop.f32.mrb[8].mxu0 }
 0x2d0   : > { %v937_v53 = vadd.f32 %v936_v51, %v923_v52  ;;  %v925_v54 = vpop.f32.mrb[9].mxu0 }
 0x2d1   : > { %v938_v55 = vadd.f32 %v936_v51, %v925_v54 }
 0x2d3   : > { %v941_v57 = vcombine.low %v937_v53, %v938_v55 }
 0x2d5   : > { %v948_v58 = vrot.slane %v941_v57, %v947_v56 }
 0x2d7   : > { %v955_v59 = vrot.slane %v948_v58, %v947_v56 }
 0x2d9   : > { %961 = vst.msk [vmem:[%s352_s28] sm:$0x3] %vm959_vm3, %v955_v59 }
 0x2da   : > { %1190 = shalt.err (!%p1187_p5)
}
 0x2db   : > { %s1191_s25 = scalar_lea.hbm %s1479_s8, 32  ;;  %s1195_s28 = scalar_lea.hbm %s1535_s9, 64 }
 0x2dc   : > { %p1192_p6 = scmp.ne.s32.totalorder %s1479_s8, %s1191_s25  ;;  %p1196_p10 = scmp.lt.u32.totalorder %s1479_s8, %s1535_s9 }
 0x2dd   : > { %p1197_p11 = scmp.lt.u32.totalorder %s1195_s28, %s1191_s25  ;;  %p1199_p13 = scmp.lt.u32.totalorder %s1191_s25, %s1479_s8 }
 0x2de   : > { %p1193_p7 = pnand %p1192_p6, %p1354_p4 }
 0x2df   : > { %p1198_p12 = por %p1197_p11, %p1196_p10 }
 0x2e0   : > { %p1194_p9 = pneg %p1193_p7 }
 0x2e1   : > { %p1200_p0 = por %p1199_p13, %p1198_p12 }
 0x2e3   : > { %p1201_p1 = pnand %p1200_p0, %p1194_p9 }
 0x2e5   : > { %1204 = shalt.err (!%p1201_p1)
}
 0x2e6   : > { %1116 = dma.vmem_to_hbm [thread:$0]  (%p1354_p4), %s1481_s30, 32, %s1479_s8, %s963_s17  }
 0x2e7 PF: > { %p1122_p2 = scmp.ge.s32.totalorder %s1255_s16, 2  ;;  %s991_s19 = sand.u32 1, %s1235_s11  }
 0x2e8   : > { %s992_s14 = scalar_lea.sflag [#allocation4], %s991_s19 }
 0x2e9   : > { %p1119_p3 = pnand %p1122_p2, %p1361_p8 }
 0x2eb   : > { %1230 = dma.done.wait (!%p1119_p3), %s992_s14, 32  }
 0x2ec   : > { %1232 = vsyncadd (!%p1119_p3), %s992_s14, 4294967264  ;;  %s24_s16 = sadd.s32 1, %s1255_s16   ;;  %s1538_s11 = smov %s1239_s12 }
 0x2ed   : > { %p21_p5 = scmp.ge.s32.totalorder %s24_s16, 4   ;;  %s1539_s12 = smov %s1243_s13 }
 0x2ee   : > { %s1540_s13 = smov %s1367_s23  ;;  %s1541_s14 = smov %s1251_s15 }
 0x2ef   : > { %s1542_s15 = smov %s1544_s18  ;;  %23 = sbr.rel (!%p21_p5) target bundleno = 7 (0x7), region = 91 }
 0x2f6   :  { %997 = vsyncpa [#allocation4], 1 }
 0x2f7   :  { %999 = vsyncpa [#allocation4 + $0x1], 1 }

</bundles_post_ra>
